<compile_context>
chip_gen: v6e
topology: v6e:2x2x1
jax: 0.10.0
libtpu: 0.0.40
codegen_flags: <defaults>
</compile_context>

<pallas_src>
import jax
import jax.numpy as jnp
from jax.experimental import pallas as pl
from jax.experimental.pallas import tpu as pltpu

_LN_EPS = 1e-12


def _gelu(x):
    # tanh-approx GELU, used identically in kernel and reference.
    # TODO(synk): mmf/HF 'gelu' is the erf-based GELU; swap if exact parity
    # with the PyTorch checkpoint is required.
    return 0.5 * x * (1.0 + jnp.tanh(0.7978845608028654 * (x + 0.044715 * x * x * x)))


def _round_up(x, m):
    return (x + m - 1) // m * m


def _vmem_capacity_bytes():
    try:
        return int(pltpu.get_tpu_info().vmem_capacity_bytes)
    except Exception:
        return 128 << 20  # conservative default (v5e/v6e)


# ---------------------------------------------------------------------------
# Prediction head kernel:  dense(H,H) -> gelu -> LayerNorm -> decoder(H,V)+bias
# Shared by the text LM head and the image prediction head.
# Grid = (row tiles ["parallel"], vocab tiles ["arbitrary"]).
# The dense->gelu->LN transform is computed once per row tile (j == 0), cached
# in a bf16 VMEM scratch and reused for every decoder (vocab) tile.
# ---------------------------------------------------------------------------
def _prediction_head_kernel(x_ref, w1_ref, b1_ref, g_ref, bt_ref,
                            w2_ref, b2_ref, out_ref, h_scratch):
    @pl.when(pl.program_id(1) == 0)
    def _():
        x = x_ref[...].astype(jnp.bfloat16)                         # native -> bf16
        # Weights pre-transposed to [in, out] in the wrapper: no in-kernel .T.
        h = jnp.dot(x, w1_ref[...], preferred_element_type=jnp.float32)
        h = h + b1_ref[...]                                          # f32 math
        h = _gelu(h)
        mu = jnp.mean(h, axis=-1, keepdims=True)
        var = jnp.mean(jnp.square(h - mu), axis=-1, keepdims=True)
        h = (h - mu) * jax.lax.rsqrt(var + _LN_EPS)                  # rsqrt -> EUP
        h_scratch[...] = (h * g_ref[...] + bt_ref[...]).astype(jnp.bfloat16)

    # Lane-dense (TN, TV) store; decoder weight streamed tile-by-tile over V.
    acc = jnp.dot(h_scratch[...], w2_ref[...],
                  preferred_element_type=jnp.float32) + b2_ref[...]
    out_ref[...] = acc.astype(out_ref.dtype)


def _pick_tile(total, target, align):
    """Largest tile <= target that divides `total` and is a multiple of `align`
    (falls back to the full extent, which is always legal)."""
    if total <= target:
        return total
    t = (target // align) * align
    while t >= align:
        if total % t == 0:
            return t
        t -= align
    return total


def _prediction_head(x2d, w1_t, b1, gamma, beta, w2_t, b2):
    """x2d: (N, H) native dtype.  w1_t: (H, H) bf16 [in,out].  w2_t: (H, V) bf16 [in,out]."""
    N, H = x2d.shape
    V = w2_t.shape[1]
    out_dtype = x2d.dtype

    # --- pad vocab to a multiple of 128 so tv is always lane-aligned ---------
    V_pad = _round_up(V, 128)
    if V_pad != V:
        w2_t = jnp.pad(w2_t, ((0, 0), (0, V_pad - V)))
        b2 = jnp.pad(b2, (0, V_pad - V))

    # --- generation-aware tiling / VMEM budget --------------------------------
    vmem_phys = _vmem_capacity_bytes()
    small_vmem = vmem_phys <= (64 << 20)            # v7x-like (64 MiB / TC)
    row_target = 512 if small_vmem else 1024        # fewer W2 re-streams on v5e/v6e
    vmem_cap = int(vmem_phys * 3 // 4)              # ~48 MiB on v7x, ~96 MiB on v5e/v6e

    tn = min(row_target, _round_up(N, 8))           # row tile (multiple of 8)
    N_pad = _round_up(N, tn)
    if N_pad != N:
        x2d = jnp.pad(x2d, ((0, N_pad - N), (0, 0)))

    tv = _pick_tile(V_pad, 2048, 128)               # vocab tile (multiple of 128)

    xb = jnp.dtype(x2d.dtype).itemsize
    ob = jnp.dtype(out_dtype).itemsize
    vmem_bytes = (2 * tn * H * xb            # x tiles (native dtype, double buffered)
                  + 1 * H * H * 2            # W1 bf16 (single-buffered, Buffered(1))
                  + 3 * 8 * max(H, 128) * 4  # b1 / gamma / beta (padded, single buf)
                  + 2 * H * tv * 2           # W2 tiles bf16
                  + 2 * 8 * tv * 4           # b2 tiles
                  + 2 * tn * tv * ob         # output tiles
                  + tn * H * 2)              # h_scratch bf16
    vmem_bytes = int(min(max(vmem_bytes + (2 << 20), 16 << 20), vmem_cap))

    const_spec = lambda shape: pl.BlockSpec(shape, lambda i, j: (0, 0),
                                            pipeline_mode=pl.Buffered(1))

    out = pl.pallas_call(
        _prediction_head_kernel,
        out_shape=jax.ShapeDtypeStruct((N_pad, V_pad), out_dtype),
        grid=(N_pad // tn, V_pad // tv),
        in_specs=[
            pl.BlockSpec((tn, H), lambda i, j: (i, 0)),    # activations (row tile)
            const_spec((H, H)),                            # dense W  [in,out] bf16
            const_spec((1, H)),                            # dense bias       f32
            const_spec((1, H)),                            # LayerNorm gamma  f32
            const_spec((1, H)),                            # LayerNorm beta   f32
            pl.BlockSpec((H, tv), lambda i, j: (0, j)),    # decoder W tile   bf16
            pl.BlockSpec((1, tv), lambda i, j: (0, j)),    # decoder bias tile f32
        ],
        out_specs=pl.BlockSpec((tn, tv), lambda i, j: (i, j)),
        scratch_shapes=[pltpu.VMEM((tn, H), jnp.bfloat16)],
        compiler_params=pltpu.CompilerParams(
            dimension_semantics=("parallel", "arbitrary"),
            vmem_limit_bytes=vmem_bytes),
    )(x2d, w1_t, b1.reshape(1, H).astype(jnp.float32),
      gamma.reshape(1, H).astype(jnp.float32),
      beta.reshape(1, H).astype(jnp.float32),
      w2_t, b2.reshape(1, V_pad).astype(jnp.float32))

    return out[:N, :V]


# ---------------------------------------------------------------------------
# Fusion (sum / mul) + bi_seq_relationship Linear(bi_hidden, 2)
# Tiny: single untiled pallas_call (feedback: do not tile; negligible cost).
# ---------------------------------------------------------------------------
def _seq_rel_kernel(fusion_method):
    def kernel(pt_ref, pv_ref, w_ref, b_ref, out_ref):
        if fusion_method == "sum":
            pooled = pt_ref[...] + pv_ref[...]
        elif fusion_method == "mul":
            pooled = pt_ref[...] * pv_ref[...]
        else:
            raise AssertionError(fusion_method)
        # TODO(synk): nn.Dropout(0.1) on the pooled output omitted (inference mode).
        out_ref[...] = (jnp.dot(pooled, w_ref[...],
                                preferred_element_type=jnp.float32)
                        + b_ref[...]).astype(out_ref.dtype)
    return kernel


def _seq_relationship(pooled_t, pooled_v, w_t, b, fusion_method):
    B, Hb = pooled_t.shape
    n_cls = w_t.shape[1]
    return pl.pallas_call(
        _seq_rel_kernel(fusion_method),
        out_shape=jax.ShapeDtypeStruct((B, n_cls), jnp.float32),
        grid=(1,),
        in_specs=[
            pl.BlockSpec((B, Hb), lambda i: (0, 0)),
            pl.BlockSpec((B, Hb), lambda i: (0, 0)),
            pl.BlockSpec((Hb, n_cls), lambda i: (0, 0)),
            pl.BlockSpec((1, n_cls), lambda i: (0, 0)),
        ],
        out_specs=pl.BlockSpec((B, n_cls), lambda i: (0, 0)),
        compiler_params=pltpu.CompilerParams(
            dimension_semantics=("arbitrary",)),
    )(pooled_t.astype(jnp.float32), pooled_v.astype(jnp.float32),
      w_t.astype(jnp.float32), b.reshape(1, n_cls).astype(jnp.float32))


# ---------------------------------------------------------------------------
# BertPreTrainingHeads.forward
# ---------------------------------------------------------------------------
def bert_pretraining_heads(sequence_output_t, sequence_output_v,
                           pooled_output_t, pooled_output_v,
                           params, fusion_method="sum"):
    B, St, H = sequence_output_t.shape
    _, Rv, Hv = sequence_output_v.shape
    lm, img, sr = params["lm"], params["img"], params["seq_rel"]

    # Pre-transpose all nn.Linear weights ([out,in] -> [in,out]) once outside
    # the kernels (no in-kernel .T) and store the matmul weights in bf16.
    pred_t = _prediction_head(
        sequence_output_t.reshape(B * St, H),           # native dtype, no f32 copy
        lm["w1"].T.astype(jnp.bfloat16), lm["b1"], lm["gamma"], lm["beta"],
        lm["w2"].T.astype(jnp.bfloat16), lm["b2"])
    V = lm["w2"].shape[0]

    pred_v = _prediction_head(
        sequence_output_v.reshape(B * Rv, Hv),
        img["w1"].T.astype(jnp.bfloat16), img["b1"], img["gamma"], img["beta"],
        img["w2"].T.astype(jnp.bfloat16), img["b2"])
    Vt = img["w2"].shape[0]

    seq_rel = _seq_relationship(pooled_output_t, pooled_output_v,
                                sr["w"].T, sr["b"], fusion_method)

    return pred_t.reshape(B, St, V), pred_v.reshape(B, Rv, Vt), seq_rel


# ---------------------------------------------------------------------------
# Pure-JAX (f32) reference mirroring the PyTorch forward
# ---------------------------------------------------------------------------
def _reference(seq_t, seq_v, pooled_t, pooled_v, params, fusion_method):
    def head(x, p):
        h = x @ p["w1"].T + p["b1"]
        h = _gelu(h)
        mu = h.mean(-1, keepdims=True)
        var = ((h - mu) ** 2).mean(-1, keepdims=True)
        h = (h - mu) / jnp.sqrt(var + _LN_EPS)
        h = h * p["gamma"] + p["beta"]
        return h @ p["w2"].T + p["b2"]

    pred_t = head(seq_t, params["lm"])
    pred_v = head(seq_v, params["img"])
    if fusion_method == "sum":
        pooled = pooled_t + pooled_v
    else:
        pooled = pooled_t * pooled_v
    seq_rel = pooled @ params["seq_rel"]["w"].T + params["seq_rel"]["b"]
    return pred_t, pred_v, seq_rel


if __name__ == "__main__":
    # Small config: hidden_size=32, vocab=64, v_hidden=32, v_target=48, bi_hidden=32.
    B, St, Rv = 2, 8, 4
    H, V = 32, 64
    Hv, Vt = 32, 48
    Hb = 32
    fusion_method = "sum"

    key = jax.random.PRNGKey(0)
    ks = jax.random.split(key, 18)
    init = 0.02
    params = {
        "lm": {
            "w1": init * jax.random.normal(ks[0], (H, H), jnp.float32),
            "b1": init * jax.random.normal(ks[1], (H,), jnp.float32),
            "gamma": 1.0 + init * jax.random.normal(ks[2], (H,), jnp.float32),
            "beta": init * jax.random.normal(ks[3], (H,), jnp.float32),
            "w2": init * jax.random.normal(ks[4], (V, H), jnp.float32),
            "b2": init * jax.random.normal(ks[5], (V,), jnp.float32),
        },
        "img": {
            "w1": init * jax.random.normal(ks[6], (Hv, Hv), jnp.float32),
            "b1": init * jax.random.normal(ks[7], (Hv,), jnp.float32),
            "gamma": 1.0 + init * jax.random.normal(ks[8], (Hv,), jnp.float32),
            "beta": init * jax.random.normal(ks[9], (Hv,), jnp.float32),
            "w2": init * jax.random.normal(ks[10], (Vt, Hv), jnp.float32),
            "b2": init * jax.random.normal(ks[11], (Vt,), jnp.float32),
        },
        "seq_rel": {
            "w": init * jax.random.normal(ks[12], (2, Hb), jnp.float32),
            "b": init * jax.random.normal(ks[13], (2,), jnp.float32),
        },
    }

    seq_t = jax.random.normal(ks[14], (B, St, H), jnp.float32)
    seq_v = jax.random.normal(ks[15], (B, Rv, Hv), jnp.float32)
    pooled_t = jax.random.normal(ks[16], (B, Hb), jnp.float32)
    pooled_v = jax.random.normal(ks[17], (B, Hb), jnp.float32)

    pred_t, pred_v, seq_rel = bert_pretraining_heads(
        seq_t, seq_v, pooled_t, pooled_v, params, fusion_method)
    pred_t, pred_v, seq_rel = jax.block_until_ready((pred_t, pred_v, seq_rel))

    ref_t, ref_v, ref_rel = _reference(seq_t, seq_v, pooled_t, pooled_v,
                                       params, fusion_method)

    assert pred_t.shape == (B, St, V)
    assert pred_v.shape == (B, Rv, Vt)
    assert seq_rel.shape == (B, 2)
    # bf16 weights / bf16 transform cache with f32 accumulation -> loose-ish tol.
    for got, ref in ((pred_t, ref_t), (pred_v, ref_v)):
        assert jnp.all(jnp.isfinite(got))
        assert jnp.allclose(got.astype(jnp.float32), ref, atol=2e-2, rtol=2e-2), \
            "prediction head mismatch vs reference"
    assert jnp.allclose(seq_rel, ref_rel, atol=5e-4, rtol=5e-3), \
        "seq_relationship mismatch vs reference"

    print("KERNEL_OK")
</pallas_src>

<mosaic_0001>
module attributes {stable_mosaic.version = 11 : i64} {
  func.func @_prediction_head_kernel(%arg0: i32, %arg1: i32, %arg2: memref<16x32xf32, #tpu.memory_space<vmem>>, %arg3: memref<32x32xbf16, #tpu.memory_space<vmem>>, %arg4: memref<1x32xf32, #tpu.memory_space<vmem>>, %arg5: memref<1x32xf32, #tpu.memory_space<vmem>>, %arg6: memref<1x32xf32, #tpu.memory_space<vmem>>, %arg7: memref<32x128xbf16, #tpu.memory_space<vmem>>, %arg8: memref<1x128xf32, #tpu.memory_space<vmem>>, %arg9: memref<16x128xf32, #tpu.memory_space<vmem>>, %arg10: memref<16x32xbf16, #tpu.memory_space<vmem>>) attributes {dimension_semantics = [#tpu.dimension_semantics<parallel>, #tpu.dimension_semantics<arbitrary>], iteration_bounds = array<i64: 1, 1>, scalar_prefetch = 0 : i64, scratch_operands = 1 : i64, tpu.core_type = #tpu.core_type<tc>, window_params = [{transform_indices = @transform_0, window_bounds = array<i64: 16, 32>}, {pipeline_mode = #tpu.pipeline_mode<synchronous>, transform_indices = @transform_1, window_bounds = array<i64: 32, 32>}, {pipeline_mode = #tpu.pipeline_mode<synchronous>, transform_indices = @transform_2, window_bounds = array<i64: 1, 32>}, {pipeline_mode = #tpu.pipeline_mode<synchronous>, transform_indices = @transform_3, window_bounds = array<i64: 1, 32>}, {pipeline_mode = #tpu.pipeline_mode<synchronous>, transform_indices = @transform_4, window_bounds = array<i64: 1, 32>}, {transform_indices = @transform_5, window_bounds = array<i64: 32, 128>}, {transform_indices = @transform_6, window_bounds = array<i64: 1, 128>}, {transform_indices = @transform_7, window_bounds = array<i64: 16, 128>}]} {
    %c0_i32 = arith.constant 0 : i32
    %0 = arith.cmpi eq, %arg1, %c0_i32 : i32
    %1 = arith.extui %0 : i1 to i32
    %c0_i32_0 = arith.constant 0 : i32
    %2 = arith.cmpi ne, %1, %c0_i32_0 : i32
    scf.if %2 {
      %c0_8 = arith.constant 0 : index
      %c0_9 = arith.constant 0 : index
      %10 = vector.load %arg2[%c0_8, %c0_9] : memref<16x32xf32, #tpu.memory_space<vmem>>, vector<16x32xf32>
      %11 = arith.truncf %10 : vector<16x32xf32> to vector<16x32xbf16>
      %c0_10 = arith.constant 0 : index
      %c0_11 = arith.constant 0 : index
      %12 = vector.load %arg3[%c0_10, %c0_11] : memref<32x32xbf16, #tpu.memory_space<vmem>>, vector<32x32xbf16>
      %cst_12 = arith.constant dense<0.000000e+00> : vector<16x32xf32>
      %13 = tpu.matmul %11, %12, %cst_12 {dimension_numbers = #tpu.dot_dimension_numbers<[1], [0], [0], [1], [0, 0, 1, 1], [], []>} : vector<16x32xbf16>, vector<32x32xbf16>, vector<16x32xf32> -> vector<16x32xf32>
      %c0_13 = arith.constant 0 : index
      %c0_14 = arith.constant 0 : index
      %14 = vector.load %arg4[%c0_13, %c0_14] : memref<1x32xf32, #tpu.memory_space<vmem>>, vector<1x32xf32>
      %15 = vector.broadcast %14 : vector<1x32xf32> to vector<16x32xf32>
      %16 = arith.addf %13, %15 : vector<16x32xf32>
      %cst_15 = arith.constant 5.000000e-01 : f32
      %17 = vector.broadcast %cst_15 : f32 to vector<16x32xf32>
      %18 = arith.mulf %17, %16 : vector<16x32xf32>
      %cst_16 = arith.constant 4.471500e-02 : f32
      %19 = vector.broadcast %cst_16 : f32 to vector<16x32xf32>
      %20 = arith.mulf %19, %16 : vector<16x32xf32>
      %21 = arith.mulf %20, %16 : vector<16x32xf32>
      %22 = arith.mulf %21, %16 : vector<16x32xf32>
      %23 = arith.addf %16, %22 : vector<16x32xf32>
      %cst_17 = arith.constant 0.797884583 : f32
      %24 = vector.broadcast %cst_17 : f32 to vector<16x32xf32>
      %25 = arith.mulf %24, %23 : vector<16x32xf32>
      %26 = math.tanh %25 : vector<16x32xf32>
      %cst_18 = arith.constant 1.000000e+00 : f32
      %27 = vector.broadcast %cst_18 : f32 to vector<16x32xf32>
      %28 = arith.addf %27, %26 : vector<16x32xf32>
      %29 = arith.mulf %18, %28 : vector<16x32xf32>
      %cst_19 = arith.constant dense<0.000000e+00> : vector<16xf32>
      %30 = vector.multi_reduction <add>, %29, %cst_19 [1] : vector<16x32xf32> to vector<16xf32>
      %31 = vector.shape_cast %30 : vector<16xf32> to vector<16x1xf32>
      %cst_20 = arith.constant 3.200000e+01 : f32
      %32 = vector.broadcast %cst_20 : f32 to vector<16x1xf32>
      %33 = arith.divf %31, %32 : vector<16x1xf32>
      %34 = vector.broadcast %33 : vector<16x1xf32> to vector<16x32xf32>
      %35 = arith.subf %29, %34 : vector<16x32xf32>
      %36 = arith.mulf %35, %35 : vector<16x32xf32>
      %cst_21 = arith.constant dense<0.000000e+00> : vector<16xf32>
      %37 = vector.multi_reduction <add>, %36, %cst_21 [1] : vector<16x32xf32> to vector<16xf32>
      %38 = vector.shape_cast %37 : vector<16xf32> to vector<16x1xf32>
      %cst_22 = arith.constant 3.200000e+01 : f32
      %39 = vector.broadcast %cst_22 : f32 to vector<16x1xf32>
      %40 = arith.divf %38, %39 : vector<16x1xf32>
      %41 = vector.broadcast %33 : vector<16x1xf32> to vector<16x32xf32>
      %42 = arith.subf %29, %41 : vector<16x32xf32>
      %cst_23 = arith.constant 9.99999996E-13 : f32
      %43 = vector.broadcast %cst_23 : f32 to vector<16x1xf32>
      %44 = arith.addf %40, %43 : vector<16x1xf32>
      %45 = math.rsqrt %44 : vector<16x1xf32>
      %46 = vector.broadcast %45 : vector<16x1xf32> to vector<16x32xf32>
      %47 = arith.mulf %42, %46 : vector<16x32xf32>
      %c0_24 = arith.constant 0 : index
      %c0_25 = arith.constant 0 : index
      %48 = vector.load %arg5[%c0_24, %c0_25] : memref<1x32xf32, #tpu.memory_space<vmem>>, vector<1x32xf32>
      %49 = vector.broadcast %48 : vector<1x32xf32> to vector<16x32xf32>
      %50 = arith.mulf %47, %49 : vector<16x32xf32>
      %c0_26 = arith.constant 0 : index
      %c0_27 = arith.constant 0 : index
      %51 = vector.load %arg6[%c0_26, %c0_27] : memref<1x32xf32, #tpu.memory_space<vmem>>, vector<1x32xf32>
      %52 = vector.broadcast %51 : vector<1x32xf32> to vector<16x32xf32>
      %53 = arith.addf %50, %52 : vector<16x32xf32>
      %54 = arith.truncf %53 : vector<16x32xf32> to vector<16x32xbf16>
      %c0_28 = arith.constant 0 : index
      %c0_29 = arith.constant 0 : index
      %55 = vector.load %arg10[%c0_28, %c0_29] : memref<16x32xbf16, #tpu.memory_space<vmem>>, vector<16x32xbf16>
      tpu.vector_store %arg10[%c0_28, %c0_29], %54 {strides = array<i32>} : memref<16x32xbf16, #tpu.memory_space<vmem>>, vector<16x32xbf16>,
    } else {
    }
    %c0 = arith.constant 0 : index
    %c0_1 = arith.constant 0 : index
    %3 = vector.load %arg10[%c0, %c0_1] : memref<16x32xbf16, #tpu.memory_space<vmem>>, vector<16x32xbf16>
    %c0_2 = arith.constant 0 : index
    %c0_3 = arith.constant 0 : index
    %4 = vector.load %arg7[%c0_2, %c0_3] : memref<32x128xbf16, #tpu.memory_space<vmem>>, vector<32x128xbf16>
    %cst = arith.constant dense<0.000000e+00> : vector<16x128xf32>
    %5 = tpu.matmul %3, %4, %cst {dimension_numbers = #tpu.dot_dimension_numbers<[1], [0], [0], [1], [0, 0, 1, 1], [], []>} : vector<16x32xbf16>, vector<32x128xbf16>, vector<16x128xf32> -> vector<16x128xf32>
    %c0_4 = arith.constant 0 : index
    %c0_5 = arith.constant 0 : index
    %6 = vector.load %arg8[%c0_4, %c0_5] : memref<1x128xf32, #tpu.memory_space<vmem>>, vector<1x128xf32>
    %7 = vector.broadcast %6 : vector<1x128xf32> to vector<16x128xf32>
    %8 = arith.addf %5, %7 : vector<16x128xf32>
    %c0_6 = arith.constant 0 : index
    %c0_7 = arith.constant 0 : index
    %9 = vector.load %arg9[%c0_6, %c0_7] : memref<16x128xf32, #tpu.memory_space<vmem>>, vector<16x128xf32>
    tpu.vector_store %arg9[%c0_6, %c0_7], %8 {strides = array<i32>} : memref<16x128xf32, #tpu.memory_space<vmem>>, vector<16x128xf32>,
    return
  }
  func.func @transform_0(%arg0: i32, %arg1: i32) -> (i32, i32) {
    %c0_i32 = arith.constant 0 : i32
    %c0_i32_0 = arith.constant 0 : i32
    return %arg0, %c0_i32 : i32, i32
  }
  func.func @transform_1(%arg0: i32, %arg1: i32) -> (i32, i32) {
    %c0_i32 = arith.constant 0 : i32
    %c0_i32_0 = arith.constant 0 : i32
    %c0_i32_1 = arith.constant 0 : i32
    return %c0_i32, %c0_i32_0 : i32, i32
  }
  func.func @transform_2(%arg0: i32, %arg1: i32) -> (i32, i32) {
    %c0_i32 = arith.constant 0 : i32
    %c0_i32_0 = arith.constant 0 : i32
    %c0_i32_1 = arith.constant 0 : i32
    return %c0_i32, %c0_i32_0 : i32, i32
  }
  func.func @transform_3(%arg0: i32, %arg1: i32) -> (i32, i32) {
    %c0_i32 = arith.constant 0 : i32
    %c0_i32_0 = arith.constant 0 : i32
    %c0_i32_1 = arith.constant 0 : i32
    return %c0_i32, %c0_i32_0 : i32, i32
  }
  func.func @transform_4(%arg0: i32, %arg1: i32) -> (i32, i32) {
    %c0_i32 = arith.constant 0 : i32
    %c0_i32_0 = arith.constant 0 : i32
    %c0_i32_1 = arith.constant 0 : i32
    return %c0_i32, %c0_i32_0 : i32, i32
  }
  func.func @transform_5(%arg0: i32, %arg1: i32) -> (i32, i32) {
    %c0_i32 = arith.constant 0 : i32
    %c0_i32_0 = arith.constant 0 : i32
    return %c0_i32, %arg1 : i32, i32
  }
  func.func @transform_6(%arg0: i32, %arg1: i32) -> (i32, i32) {
    %c0_i32 = arith.constant 0 : i32
    %c0_i32_0 = arith.constant 0 : i32
    return %c0_i32, %arg1 : i32, i32
  }
  func.func @transform_7(%arg0: i32, %arg1: i32) -> (i32, i32) {
    %c0_i32 = arith.constant 0 : i32
    return %arg0, %arg1 : i32, i32
  }
}

</mosaic_0001>

<bundles_post_ra>
// kernel: tpu_custom_call.1
= control target key start
LH: loop header
LB: loop body
LE: loop exit
PB: predicated region body
PF: predicated region fallthrough
CT: control target
= control target key end

     0   :  { %12 = vsyncpa [#allocation4], 0  ;;  %s545_s0 = inlined_call_operand.hbm [shape: f32[16,32], index: 0, kind: input, shape index: {}]   ;;  %s546_s1 = inlined_call_operand.hbm [shape: bf16[32,32], index: 1, kind: input, shape index: {}]   ;;  %s547_s2 = inlined_call_operand.vmem [shape: f32[1,32], index: 2, kind: input, shape index: {}]   ;;  %s548_s3 = inlined_call_operand.vmem [shape: f32[1,32], index: 3, kind: input, shape index: {}]   ;;  %s549_s4 = inlined_call_operand.vmem [shape: f32[1,32], index: 4, kind: input, shape index: {}]   ;;  %s550_s5 = inlined_call_operand.hbm [shape: bf16[32,128], index: 5, kind: input, shape index: {}]   ;;  %s551_s6 = inlined_call_operand.vmem [shape: f32[1,128], index: 6, kind: input, shape index: {}]   ;;  %s552_s7 = inlined_call_operand.hbm [shape: f32[16,128], index: 7, kind: output, shape index: {}]  }
   0x1   :  { %13 = vsyncpa [#allocation7], 0 }
   0x2   :  { %14 = vsyncpa [#allocation5], 0  ;;  %s459_s24 = smov [#allocation6]  }
   0x3   :  { %s32_s25 = sshll.u32 %s459_s24, 4  ;;  %s33_s25 = int_to_ptr.vmem [resolvable:$true] %s32_s25 }
   0x4   :  { %s381_s26 = scalar_lea.vmem %s33_s25, 256  ;;  %p386_p1 = scmp.lt.s32.totalorder %s33_s25, %s33_s25 }
   0x5   :  { %p382_p0 = scmp.ne.s32.totalorder %s33_s25, %s381_s26  ;;  %p387_p2 = scmp.lt.s32.totalorder %s381_s26, %s381_s26 }
   0x7   :  { %p388_p3 = por %p387_p2, %p386_p1 }
   0x9   :  { %p389_p4 = pnand %p388_p3, %p382_p0 }
   0xb   :  { %392 = shalt.err (!%p389_p4)
}
   0xc   :  { %s460_s27 = smov 64   ;;  %s461_s28 = smov 4  }
   0xd   :  { %38 = dma.hbm_to_vmem [thread:$0]  %s546_s1, 256, %s33_s25, [#allocation7], %s460_s27, %s460_s27, %s461_s28  }
   0xe   :  { %s462_s8 = smov [#allocation3]  }
   0xf   :  { %s20_s9 = sshll.u32 %s462_s8, 4  ;;  %s21_s9 = int_to_ptr.vmem [resolvable:$true] %s20_s9 }
  0x10   :  { %s401_s10 = scalar_lea.vmem %s21_s9, 256  ;;  %p406_p6 = scmp.lt.s32.totalorder %s21_s9, %s21_s9 }
  0x11   :  { %p402_p5 = scmp.ne.s32.totalorder %s21_s9, %s401_s10  ;;  %p407_p7 = scmp.lt.s32.totalorder %s401_s10, %s401_s10 }
  0x13   :  { %p408_p8 = por %p407_p7, %p406_p6 }
  0x15   :  { %p409_p9 = pnand %p408_p8, %p402_p5 }
  0x17   :  { %412 = shalt.err (!%p409_p9)
}
  0x18   :  { %s463_s11 = smov 128   ;;  %s464_s12 = smov 8  }
  0x19   :  { %26 = dma.hbm_to_vmem [thread:$0]  %s545_s0, 256, %s21_s9, [#allocation4], %s463_s11, %s463_s11, %s464_s12  }
  0x1a   :  { %s465_s1 = smov [#allocation8]  }
  0x1b   :  { %s50_s15 = sshll.u32 %s465_s1, 4  ;;  %s51_s15 = int_to_ptr.vmem [resolvable:$true] %s50_s15 }
  0x1c   :  { %s421_s16 = scalar_lea.vmem %s51_s15, 256  ;;  %p426_p11 = scmp.lt.s32.totalorder %s51_s15, %s51_s15 }
  0x1d   :  { %p422_p10 = scmp.ne.s32.totalorder %s51_s15, %s421_s16  ;;  %p427_p12 = scmp.lt.s32.totalorder %s421_s16, %s421_s16 }
  0x1f   :  { %p428_p13 = por %p427_p12, %p426_p11 }
  0x21   :  { %p429_p0 = pnand %p428_p13, %p422_p10 }
  0x23   :  { %432 = shalt.err (!%p429_p0)
}
  0x24   :  { %56 = dma.hbm_to_vmem [thread:$0]  %s550_s5, 256, %s51_s15, [#allocation7], %s460_s27, %s460_s27, %s461_s28  }
  0x25   :  { %453 = dma.done.wait [#allocation4], 256  }
  0x26   :  { %454 = vsyncadd [#allocation4], 4294967040 }
  0x27   :  { %455 = dma.done.wait [#allocation7], 512  }
  0x28   :  { %456 = vsyncadd [#allocation7], 4294966784  ;;  %v466_v0 = vmov 0.0   ;;  %vm467_vm0 = vmmov 0   ;;  %v360_v1 = vld [vmem:[#allocation6 + $0x8] sm:$0xff]   ;;  %v361_v2 = vld [vmem:[#allocation6] sm:$0xff]  }
  0x29   :  { %334 = vmatprep.subr.bf16.mxu0 %v466_v0  ;;  %338 = vmatprep.mubr.msk.bf16.mxu0 %vm467_vm0, %v466_v0  ;;  %v73_v3 = vld [vmem:[#allocation3] sm:$0xff]  ;;  %v74_v4 = vld [vmem:[#allocation3 + $0x8] sm:$0xff]  ;;  %vm99_vm1 = vcmask 261120   ;;  %v313_v6 = vld [vmem:[%s547_s2] ss:$0 sm:$0xff]  ;;  %vm215_vm2 = vcmask 257024  }
  0x2a   :  { %342 = vmatprep.subr.bf16.mxu1 %v466_v0  ;;  %346 = vmatprep.mubr.msk.bf16.mxu1 %vm467_vm0, %v466_v0  ;;  %v75_v5 = vpack.c.bf16 %v74_v4, %v73_v3  ;;  %v362_v43 = vld [vmem:[#allocation8 + $0x8] sm:$0xff]   ;;  %v363_v44 = vld [vmem:[#allocation8] sm:$0xff]   ;;  %v317_v52 = vld [vmem:[%s548_s3] ss:$0 sm:$0xff] }
  0x2b   :  { %335 = vmatpush3.bf16.msra.mxu0 %v360_v1  ;;  %343 = vmatpush3.bf16.msra.mxu1 %v362_v43  ;;  %v318_v54 = vld [vmem:[%s549_s4] ss:$0 sm:$0xff]  ;;  %s468_s4 = smov [#allocation9]  }
  0x2c   :  { %336 = vmatprep.subr.bf16.mxu0 %v466_v0  ;;  %344 = vmatprep.subr.bf16.mxu1 %v466_v0  ;;  %v321_v0 = vld [vmem:[%s551_s6] ss:$0 sm:$0xff]  ;;  %s300_s23 = sshll.u32 %s468_s4, 4  ;;  %s301_s23 = int_to_ptr.vmem [resolvable:$true] %s300_s23 }
  0x2d   :  { %s433_s24 = scalar_lea.vmem %s301_s23, 256  ;;  %p438_p2 = scmp.lt.s32.totalorder %s301_s23, %s301_s23 }
  0x2e   :  { %p434_p1 = scmp.ne.s32.totalorder %s301_s23, %s433_s24  ;;  %p439_p3 = scmp.lt.s32.totalorder %s433_s24, %s433_s24 }
  0x2f   :  { %337 = vmatpush3.bf16.msra.mxu0 %v361_v2  ;;  %345 = vmatpush3.bf16.msra.mxu1 %v363_v44 }
  0x30   :  { %p440_p4 = por %p439_p3, %p438_p2 }
  0x32   :  { %339 = vmatmul.mubr.msk.bf16.vlgmr.msra.gmra.mxu0 %vm99_vm1, %v75_v5  ;;  %p441_p5 = pnand %p440_p4, %p434_p1 }
  0xf2   :  { %v137_v7 = vpop.f32.mrf.mxu0 }
  0xf3   :  { %v138_v8 = vadd.f32 %v313_v6, %v137_v7 }
  0xf4   :  { %v340_v9 = vpop.f32.mrf.mxu0 }
  0xf5   :  { %v146_v10 = vmul.f32 0.044715, %v138_v8  ;;  %v144_v24 = vmul.f32 0.5, %v138_v8 }
  0xf6   :  { %v140_v11 = vpop.f32.mrf.mxu0 }
  0xf7   :  { %v141_v12 = vadd.f32 %v313_v6, %v140_v11  ;;  %v148_v13 = vmul.f32 %v146_v10, %v138_v8 }
  0xf8   :  { %v341_v14 = vpop.f32.mrf.mxu0 }
  0xf9   :  { %v147_v15 = vmul.f32 0.044715, %v141_v12  ;;  %v150_v16 = vmul.f32 %v148_v13, %v138_v8  ;;  %v145_v29 = vmul.f32 0.5, %v141_v12 }
  0xfb   :  { %v152_v17 = vadd.f32 %v150_v16, %v138_v8  ;;  %v149_v18 = vmul.f32 %v147_v15, %v141_v12 }
  0xfd   :  { %v154_v19 = vmul.f32 0.7978846, %v152_v17  ;;  %v151_v20 = vmul.f32 %v149_v18, %v141_v12 }
  0xff   :  { %365 = vtanh.f32 %v154_v19  ;;  %v153_v21 = vadd.f32 %v151_v20, %v141_v12 }
 0x101   :  { %v155_v22 = vmul.f32 0.7978846, %v153_v21 }
 0x103   :  { %367 = vtanh.f32 %v155_v22 }
 0x10c   :  { %v366_v23 = vpop.eup %365 }
 0x10d   :  { %v158_v25 = vadd.f32 1.0, %v366_v23 }
 0x10f   :  { %v160_v26 = vmul.f32 %v158_v25, %v144_v24 }
 0x110   :  { %v368_v27 = vpop.eup %367 }
 0x111   :  { %v162_v28 = vsel %vm99_vm1, %v160_v26, 0.0  ;;  %v159_v30 = vadd.f32 1.0, %v368_v27 }
 0x112   :  { %163 = vadd.xlane.f32.xlu0 %v162_v28 }
 0x113   :  { %v161_v31 = vmul.f32 %v159_v30, %v145_v29 }
 0x115   :  { %v165_v32 = vsel %vm99_vm1, %v161_v31, 0.0 }
 0x116   :  { %166 = vadd.xlane.f32.xlu0 %v165_v32 }
 0x19b   :  { %v164_v33 = vpop.xlane.xlu0 %163 }
 0x19c   :  { %v169_v34 = vmul.f32 0.03125, %v164_v33 }
 0x19e   :  { %v171_v35 = vsub.f32 %v160_v26, %v169_v34 }
 0x19f   :  { %v167_v36 = vpop.xlane.xlu0 %166 }
 0x1a0   :  { %v170_v37 = vmul.f32 0.03125, %v167_v36  ;;  %v173_v38 = vmul.f32 %v171_v35, %v171_v35 }
 0x1a2   :  { %v172_v39 = vsub.f32 %v161_v31, %v170_v37  ;;  %v175_v40 = vsel %vm99_vm1, %v173_v38, 0.0 }
 0x1a3   :  { %176 = vadd.xlane.f32.xlu1 %v175_v40 }
 0x1a4   :  { %v174_v41 = vmul.f32 %v172_v39, %v172_v39 }
 0x1a6   :  { %v178_v42 = vsel %vm99_vm1, %v174_v41, 0.0 }
 0x1a7   :  { %179 = vadd.xlane.f32.xlu1 %v178_v42 }
 0x22c   :  { %v177_v45 = vpop.xlane.xlu1 %176 }
 0x22d   :  { %v181_v46 = vmul.f32 0.03125, %v177_v45 }
 0x22f   :  { %v183_v47 = vadd.f32 1e-12, %v181_v46 }
 0x230   :  { %v180_v48 = vpop.xlane.xlu1 %179 }
 0x231   :  { %369 = vrsqrt.f32 %v183_v47  ;;  %v182_v49 = vmul.f32 0.03125, %v180_v48 }
 0x233   :  { %v184_v50 = vadd.f32 1e-12, %v182_v49 }
 0x235   :  { %371 = vrsqrt.f32 %v184_v50 }
 0x23e   :  { %v370_v51 = vpop.eup %369 }
 0x23f   :  { %v187_v53 = vmul.f32 %v370_v51, %v171_v35 }
 0x241   :  { %v196_v55 = vmul.f32 %v317_v52, %v187_v53 }
 0x242   :  { %v372_v56 = vpop.eup %371 }
 0x243   :  { %v205_v57 = vadd.f32 %v318_v54, %v196_v55  ;;  %v188_v58 = vmul.f32 %v372_v56, %v172_v39 }
 0x245   :  { %v326_v59 = vpack.c.bf16 %v205_v57, %v205_v57  ;;  %v197_v60 = vmul.f32 %v317_v52, %v188_v58 }
 0x247   :  { %216 = vst.msk [vmem:[#allocation2] sm:$0xf] %vm215_vm2, %v326_v59  ;;  %v206_v61 = vadd.f32 %v318_v54, %v197_v60 }
 0x249   :  { %v327_v62 = vpack.c.bf16 %v206_v61, %v206_v61 }
 0x24b   :  { %217 = vst.msk [vmem:[#allocation2 + $0x4] sm:$0xf] %vm215_vm2, %v327_v62 }
 0x252   :  { %v364_v63 = vld [vmem:[#allocation2] sm:$0xff]  }
 0x253   :  { %347 = vmatmul.mubr.msk.bf16.vlgmr.msra.gmra.mxu1 %vm99_vm1, %v364_v63 }
 0x313   :  { %v286_v1 = vpop.f32.mrf.mxu1 }
 0x314   :  { %v287_v2 = vadd.f32 %v321_v0, %v286_v1 }
 0x315   :  { %v348_v3 = vpop.f32.mrf.mxu1 }
 0x316   :  { %293 = vst [vmem:[#allocation9] sm:$0xff] %v287_v2 }
 0x317   :  { %v289_v4 = vpop.f32.mrf.mxu1 }
 0x318   :  { %v290_v5 = vadd.f32 %v321_v0, %v289_v4 }
 0x319   :  { %v349_v6 = vpop.f32.mrf.mxu1 }
 0x31a   :  { %294 = vst [vmem:[#allocation9 + $0x8] sm:$0xff] %v290_v5 }
 0x31b   :  { %444 = shalt.err (!%p441_p5)
}
 0x31c   :  { %306 = dma.vmem_to_hbm [thread:$0]  %s301_s23, 256, %s552_s7, [#allocation5], %s463_s11, %s463_s11, %s464_s12  }
 0x31d   :  { %457 = dma.done.wait [#allocation5], 256  }
 0x31e   :  { %458 = vsyncadd [#allocation5], 4294967040 }
 0x31f   :  { %310 = vsyncpa [#allocation4], 1 }
 0x320   :  { %311 = vsyncpa [#allocation7], 1 }
 0x321   :  { %312 = vsyncpa [#allocation5], 1 }

</bundles_post_ra>
